<compile_context>
chip_gen: v6e
topology: v6e:2x2x1
jax: 0.10.0
libtpu: 0.0.40
codegen_flags: <defaults>
</compile_context>

<pallas_src>
import math
import functools

import numpy as np
import jax
import jax.numpy as jnp
from jax import lax
from jax.experimental import pallas as pl
from jax.experimental.pallas import tpu as pltpu


# --------------------------------------------------------------------------- #
# Kernels
# --------------------------------------------------------------------------- #
def _sep_kernel(x_ref, wr_ref, wc_ref, o_ref, *, dh_taps, dw_taps, Ho, Wo):
    """Separable depthwise conv: horizontal (kW taps) then vertical (kH taps).

    x_ref : (Bnc, H, W)   input dtype
    wr_ref: (Bnc, 1, TH)  f32 per-plane row (vertical) factors
    wc_ref: (Bnc, 1, TW)  f32 per-plane col (horizontal) factors
    o_ref : (Bnc, Ho, Wo) input dtype
    """
    wr = wr_ref[...]
    wc = wc_ref[...]

    tmp = None                                          # (Bnc, H, Wo) f32
    for t, dw in enumerate(dw_taps):                    # cast per-slice (feeds the MAC)
        term = x_ref[:, :, dw:dw + Wo].astype(jnp.float32) * wc[:, :, t:t + 1]
        tmp = term if tmp is None else tmp + term

    acc = None                                          # (Bnc, Ho, Wo) f32
    for t, dh in enumerate(dh_taps):                    # dh shifts live on sublane/leading axes
        term = tmp[:, dh:dh + Ho, :] * wr[:, :, t:t + 1]
        acc = term if acc is None else acc + term

    o_ref[...] = acc.astype(o_ref.dtype)


def _tap_kernel(x_ref, w_ref, o_ref, *, taps, Ho, Wo):
    """General depthwise conv over a static list of (dh, dw) taps.

    x_ref: (Bnc, H, W) input dtype | w_ref: (Bnc, 1, T) f32 | o_ref: (Bnc, Ho, Wo)
    """
    w = w_ref[...]
    acc = None
    for t, (dh, dw) in enumerate(taps):
        term = x_ref[:, dh:dh + Ho, dw:dw + Wo].astype(jnp.float32) * w[:, :, t:t + 1]
        acc = term if acc is None else acc + term
    o_ref[...] = acc.astype(o_ref.dtype)


# --------------------------------------------------------------------------- #
# Wrapper
# --------------------------------------------------------------------------- #
def _per_channel_rank1(w_np):
    """Return (rows (C,kH), cols (C,kW)) if every channel kernel is rank-1, else None."""
    C, kH, kW = w_np.shape
    rows = np.zeros((C, kH), np.float32)
    cols = np.zeros((C, kW), np.float32)
    for c in range(C):
        u, s, vt = np.linalg.svd(w_np[c].astype(np.float64))
        r = u[:, 0] * s[0]
        v = vt[0]
        if not np.allclose(np.outer(r, v), w_np[c],
                           rtol=1e-5, atol=1e-6 * (np.abs(w_np[c]).max() + 1e-30)):
            return None
        rows[c] = r.astype(np.float32)
        cols[c] = v.astype(np.float32)
    return rows, cols


def gaussian_smoothing_pallas(x, weight):
    """x: (N, C, H, W); weight: (C, kH, kW) depthwise kernels.
    Equivalent to F.conv2d(x, weight[:, None], groups=C) — valid conv, stride 1."""
    N, C, H, W = x.shape
    Cw, kH, kW = weight.shape
    assert Cw == C, "depthwise weight must have one kernel per channel"
    assert kH <= H and kW <= W, "kernel larger than input plane"
    Ho, Wo = H - kH + 1, W - kW + 1
    NC = N * C

    # ---- concrete weight (if available) -> separability / zero-tap pruning ----
    try:
        w_np = np.asarray(jax.device_get(weight), dtype=np.float32)
    except Exception:                                   # traced weight: generic fallback
        w_np = None
    sep = _per_channel_rank1(w_np) if w_np is not None else None

    # ---- block sizing: ~6 MiB resident per grid step, aim for >=4 grid steps ----
    itemsize = jnp.dtype(x.dtype).itemsize
    f32_tmp = (H * Wo + 2 * Ho * Wo + H * W) * 4        # f32 intermediate + acc + slice slack
    per_plane = 2 * (H * W + Ho * Wo) * itemsize + f32_tmp   # double-buffered in/out + temps
    budget = 6 * 2**20
    bnc = max(1, min(budget // per_plane, -(-NC // 4), NC))
    NC_pad = -(-NC // bnc) * bnc
    grid = (NC_pad // bnc,)

    x_flat = x.reshape(NC, H, W)                        # free: collapses leading dims only
    if NC_pad != NC:
        x_flat = jnp.pad(x_flat, ((0, NC_pad - NC), (0, 0), (0, 0)))

    # ---- VMEM limit (generation-aware, 16-32 MiB) ----
    vmem_need = bnc * per_plane
    try:
        vmem_cap = int(pltpu.get_tpu_info().vmem_capacity_bytes)
    except Exception:
        vmem_cap = 64 * 2**20
    vmem_limit = int(min(max(2 * vmem_need, 16 * 2**20),
                         max(min(32 * 2**20, vmem_cap // 2), 16 * 2**20)))

    cparams = pltpu.CompilerParams(
        dimension_semantics=("parallel",),
        vmem_limit_bytes=vmem_limit,
    )

    def _tile_per_plane(tbl_c):
        """(C, K) per-channel table -> (NC_pad, 1, K) f32; plane p uses channel p % C."""
        t = np.tile(np.asarray(tbl_c, np.float32), (N, 1))
        if NC_pad != NC:
            t = np.pad(t, ((0, NC_pad - NC), (0, 0)))
        return jnp.asarray(t[:, None, :])

    # ---- choose kernel variant + per-plane weight tables ----
    if sep is not None:
        rows, cols = sep
        dh_taps = tuple(dh for dh in range(kH) if np.abs(rows[:, dh]).max() > 0) or (0,)
        dw_taps = tuple(dw for dw in range(kW) if np.abs(cols[:, dw]).max() > 0) or (0,)
        wr = _tile_per_plane(rows[:, list(dh_taps)])
        wc = _tile_per_plane(cols[:, list(dw_taps)])
        n_macs = len(dh_taps) + len(dw_taps)
        kernel = functools.partial(_sep_kernel, dh_taps=dh_taps, dw_taps=dw_taps, Ho=Ho, Wo=Wo)
        weight_ins = (wr, wc)
        w_specs = [pl.BlockSpec((bnc, 1, len(dh_taps)), lambda i: (i, 0, 0)),
                   pl.BlockSpec((bnc, 1, len(dw_taps)), lambda i: (i, 0, 0))]
    else:
        if w_np is not None:                            # concrete but non-separable: prune zeros
            nz = np.abs(w_np).max(axis=0) != 0.0
            taps = tuple((dh, dw) for dh in range(kH) for dw in range(kW) if nz[dh, dw]) or ((0, 0),)
            w_tbl = _tile_per_plane(np.stack([w_np[:, dh, dw] for (dh, dw) in taps], axis=1))
        else:                                           # traced weight: keep all taps
            taps = tuple((dh, dw) for dh in range(kH) for dw in range(kW))
            w_taps_c = jnp.stack([weight[:, dh, dw] for (dh, dw) in taps], axis=1).astype(jnp.float32)
            w_tbl = jnp.tile(w_taps_c, (N, 1))
            if NC_pad != NC:
                w_tbl = jnp.pad(w_tbl, ((0, NC_pad - NC), (0, 0)))
            w_tbl = w_tbl[:, None, :]
        n_macs = len(taps)
        kernel = functools.partial(_tap_kernel, taps=taps, Ho=Ho, Wo=Wo)
        weight_ins = (w_tbl,)
        w_specs = [pl.BlockSpec((bnc, 1, n_macs), lambda i: (i, 0, 0))]

    cost = pl.CostEstimate(
        flops=2 * n_macs * Ho * Wo * NC,
        transcendentals=0,
        bytes_accessed=NC * (H * W + Ho * Wo) * itemsize
        + sum(int(np.prod(w.shape)) * 4 for w in weight_ins),
    )

    out = pl.pallas_call(
        kernel,
        out_shape=jax.ShapeDtypeStruct((NC_pad, Ho, Wo), x.dtype),
        grid=grid,
        in_specs=[pl.BlockSpec((bnc, H, W), lambda i: (i, 0, 0))] + w_specs,
        out_specs=pl.BlockSpec((bnc, Ho, Wo), lambda i: (i, 0, 0)),
        compiler_params=cparams,
        cost_estimate=cost,
    )(x_flat, *weight_ins)

    if NC_pad != NC:
        out = out[:NC]
    return out.reshape(N, C, Ho, Wo)


# --------------------------------------------------------------------------- #
# Weight construction (mirrors GaussianSmoothing.__init__) + reference
# --------------------------------------------------------------------------- #
def build_gaussian_weight(channels, weight_size, kernel_size, sigma, dim=2):
    if isinstance(weight_size, (int, float)):
        weight_size = [int(weight_size)] * dim
    if isinstance(kernel_size, (int, float)):
        kernel_size = [int(kernel_size)] * dim
    if isinstance(sigma, (int, float)):
        sigma = [float(sigma)] * dim

    grids = jnp.meshgrid(
        *[jnp.arange(s, dtype=jnp.float32) for s in weight_size], indexing="ij")
    g = jnp.ones((), jnp.float32)
    for size, std, mgrid in zip(weight_size, sigma, grids):
        mean = (size - 1) / 2.0
        g = g * (1.0 / (std * math.sqrt(2 * math.pi))
                 * jnp.exp(-(((mgrid - mean) / std) ** 2) / 2.0))
    g = g / jnp.sum(g)

    kern = jnp.zeros(tuple(kernel_size), jnp.float32)
    kern = kern.at[0:weight_size[0], 0:weight_size[1]].set(g)
    return jnp.broadcast_to(kern[None, :, :], (channels,) + tuple(kernel_size))


def reference_conv(x, weight):
    # F.conv2d(x, weight[:, None], groups=C): valid cross-correlation, f32 precision.
    C = weight.shape[0]
    return lax.conv_general_dilated(
        x, weight[:, None, :, :],
        window_strides=(1, 1), padding="VALID",
        feature_group_count=C,
        dimension_numbers=("NCHW", "OIHW", "NCHW"),
        precision=lax.Precision.HIGHEST)


if __name__ == "__main__":
    N, C, H, W = 2, 4, 16, 16
    weight_size, kernel_size, sigma = 3, 5, 1.0

    key = jax.random.PRNGKey(0)
    x = jax.random.normal(key, (N, C, H, W), dtype=jnp.float32)

    # Path 1: the module's Gaussian weight (separable two-pass kernel).
    weight = build_gaussian_weight(C, weight_size, kernel_size, sigma, dim=2)
    out = jax.block_until_ready(gaussian_smoothing_pallas(x, weight))
    ref = jax.block_until_ready(reference_conv(x, weight))
    assert out.shape == (N, C, H - kernel_size + 1, W - kernel_size + 1)
    assert jnp.allclose(out, ref, atol=2e-5, rtol=1e-5)

    # Path 2: arbitrary (non-separable) weight, as allowed by set_weight()
    # (general pruned-tap kernel).
    w2 = 0.1 * jax.random.normal(jax.random.PRNGKey(1),
                                 (C, kernel_size, kernel_size), dtype=jnp.float32)
    out2 = jax.block_until_ready(gaussian_smoothing_pallas(x, w2))
    ref2 = jax.block_until_ready(reference_conv(x, w2))
    assert jnp.allclose(out2, ref2, atol=2e-5, rtol=1e-5)

    print("KERNEL_OK")
</pallas_src>

<mosaic_0001>
module attributes {stable_mosaic.version = 11 : i64} {
  func.func @_sep_kernel(%arg0: i32, %arg1: memref<2x16x16xf32, #tpu.memory_space<vmem>>, %arg2: memref<2x1x3xf32, #tpu.memory_space<vmem>>, %arg3: memref<2x1x3xf32, #tpu.memory_space<vmem>>, %arg4: memref<2x12x12xf32, #tpu.memory_space<vmem>>) attributes {dimension_semantics = [#tpu.dimension_semantics<parallel>], iteration_bounds = array<i64: 4>, scalar_prefetch = 0 : i64, scratch_operands = 0 : i64, tpu.core_type = #tpu.core_type<tc>, window_params = [{transform_indices = @transform_0, window_bounds = array<i64: 2, 16, 16>}, {transform_indices = @transform_1, window_bounds = array<i64: 2, 1, 3>}, {transform_indices = @transform_2, window_bounds = array<i64: 2, 1, 3>}, {transform_indices = @transform_3, window_bounds = array<i64: 2, 12, 12>}]} {
    %c0 = arith.constant 0 : index
    %c0_0 = arith.constant 0 : index
    %c0_1 = arith.constant 0 : index
    %0 = vector.load %arg2[%c0, %c0_0, %c0_1] : memref<2x1x3xf32, #tpu.memory_space<vmem>>, vector<2x1x3xf32>
    %c0_2 = arith.constant 0 : index
    %c0_3 = arith.constant 0 : index
    %c0_4 = arith.constant 0 : index
    %1 = vector.load %arg3[%c0_2, %c0_3, %c0_4] : memref<2x1x3xf32, #tpu.memory_space<vmem>>, vector<2x1x3xf32>
    %c0_5 = arith.constant 0 : index
    %c0_6 = arith.constant 0 : index
    %c0_7 = arith.constant 0 : index
    %2 = vector.load %arg1[%c0_5, %c0_6, %c0_7] : memref<2x16x16xf32, #tpu.memory_space<vmem>>, vector<2x16x12xf32>
    %3 = vector.extract_strided_slice %1 {offsets = [0, 0, 0], sizes = [2, 1, 1], strides = [1, 1, 1]} : vector<2x1x3xf32> to vector<2x1x1xf32>
    %4 = vector.broadcast %3 : vector<2x1x1xf32> to vector<2x16x12xf32>
    %5 = arith.mulf %2, %4 : vector<2x16x12xf32>
    %c0_8 = arith.constant 0 : index
    %c0_9 = arith.constant 0 : index
    %c1 = arith.constant 1 : index
    %6 = vector.load %arg1[%c0_8, %c0_9, %c1] : memref<2x16x16xf32, #tpu.memory_space<vmem>>, vector<2x16x12xf32>
    %7 = vector.extract_strided_slice %1 {offsets = [0, 0, 1], sizes = [2, 1, 1], strides = [1, 1, 1]} : vector<2x1x3xf32> to vector<2x1x1xf32>
    %8 = vector.broadcast %7 : vector<2x1x1xf32> to vector<2x16x12xf32>
    %9 = arith.mulf %6, %8 : vector<2x16x12xf32>
    %10 = arith.addf %5, %9 : vector<2x16x12xf32>
    %c0_10 = arith.constant 0 : index
    %c0_11 = arith.constant 0 : index
    %c2 = arith.constant 2 : index
    %11 = vector.load %arg1[%c0_10, %c0_11, %c2] : memref<2x16x16xf32, #tpu.memory_space<vmem>>, vector<2x16x12xf32>
    %12 = vector.extract_strided_slice %1 {offsets = [0, 0, 2], sizes = [2, 1, 1], strides = [1, 1, 1]} : vector<2x1x3xf32> to vector<2x1x1xf32>
    %13 = vector.broadcast %12 : vector<2x1x1xf32> to vector<2x16x12xf32>
    %14 = arith.mulf %11, %13 : vector<2x16x12xf32>
    %15 = arith.addf %10, %14 : vector<2x16x12xf32>
    %16 = vector.extract_strided_slice %15 {offsets = [0, 0, 0], sizes = [2, 12, 12], strides = [1, 1, 1]} : vector<2x16x12xf32> to vector<2x12x12xf32>
    %17 = vector.extract_strided_slice %0 {offsets = [0, 0, 0], sizes = [2, 1, 1], strides = [1, 1, 1]} : vector<2x1x3xf32> to vector<2x1x1xf32>
    %18 = vector.broadcast %17 : vector<2x1x1xf32> to vector<2x12x12xf32>
    %19 = arith.mulf %16, %18 : vector<2x12x12xf32>
    %20 = vector.extract_strided_slice %15 {offsets = [0, 1, 0], sizes = [2, 12, 12], strides = [1, 1, 1]} : vector<2x16x12xf32> to vector<2x12x12xf32>
    %21 = vector.extract_strided_slice %0 {offsets = [0, 0, 1], sizes = [2, 1, 1], strides = [1, 1, 1]} : vector<2x1x3xf32> to vector<2x1x1xf32>
    %22 = vector.broadcast %21 : vector<2x1x1xf32> to vector<2x12x12xf32>
    %23 = arith.mulf %20, %22 : vector<2x12x12xf32>
    %24 = arith.addf %19, %23 : vector<2x12x12xf32>
    %25 = vector.extract_strided_slice %15 {offsets = [0, 2, 0], sizes = [2, 12, 12], strides = [1, 1, 1]} : vector<2x16x12xf32> to vector<2x12x12xf32>
    %26 = vector.extract_strided_slice %0 {offsets = [0, 0, 2], sizes = [2, 1, 1], strides = [1, 1, 1]} : vector<2x1x3xf32> to vector<2x1x1xf32>
    %27 = vector.broadcast %26 : vector<2x1x1xf32> to vector<2x12x12xf32>
    %28 = arith.mulf %25, %27 : vector<2x12x12xf32>
    %29 = arith.addf %24, %28 : vector<2x12x12xf32>
    %c0_12 = arith.constant 0 : index
    %c0_13 = arith.constant 0 : index
    %c0_14 = arith.constant 0 : index
    %30 = vector.load %arg4[%c0_12, %c0_13, %c0_14] : memref<2x12x12xf32, #tpu.memory_space<vmem>>, vector<2x12x12xf32>
    tpu.vector_store %arg4[%c0_12, %c0_13, %c0_14], %29 {strides = array<i32>} : memref<2x12x12xf32, #tpu.memory_space<vmem>>, vector<2x12x12xf32>,
    return
  }
  func.func @transform_0(%arg0: i32) -> (i32, i32, i32) {
    %c0_i32 = arith.constant 0 : i32
    %c0_i32_0 = arith.constant 0 : i32
    %c0_i32_1 = arith.constant 0 : i32
    return %arg0, %c0_i32, %c0_i32_0 : i32, i32, i32
  }
  func.func @transform_1(%arg0: i32) -> (i32, i32, i32) {
    %c0_i32 = arith.constant 0 : i32
    %c0_i32_0 = arith.constant 0 : i32
    %c0_i32_1 = arith.constant 0 : i32
    return %arg0, %c0_i32, %c0_i32_0 : i32, i32, i32
  }
  func.func @transform_2(%arg0: i32) -> (i32, i32, i32) {
    %c0_i32 = arith.constant 0 : i32
    %c0_i32_0 = arith.constant 0 : i32
    %c0_i32_1 = arith.constant 0 : i32
    return %arg0, %c0_i32, %c0_i32_0 : i32, i32, i32
  }
  func.func @transform_3(%arg0: i32) -> (i32, i32, i32) {
    %c0_i32 = arith.constant 0 : i32
    %c0_i32_0 = arith.constant 0 : i32
    %c0_i32_1 = arith.constant 0 : i32
    return %arg0, %c0_i32, %c0_i32_0 : i32, i32, i32
  }
}

</mosaic_0001>

<bundles_post_ra>
// kernel: tpu_custom_call.1
= control target key start
LH: loop header
LB: loop body
LE: loop exit
PB: predicated region body
PF: predicated region fallthrough
CT: control target
= control target key end

     0   :  { %8 = vsyncpa [#allocation3], 0  ;;  %s801_s0 = inlined_call_operand.hbm [shape: f32[8,16,16], index: 0, kind: input, shape index: {}]   ;;  %s802_s1 = inlined_call_operand.vmem [shape: f32[8,1,3], index: 1, kind: input, shape index: {}]   ;;  %s803_s2 = inlined_call_operand.vmem [shape: f32[8,1,3], index: 2, kind: input, shape index: {}]   ;;  %s804_s3 = inlined_call_operand.vmem [shape: f32[8,12,12], index: 3, kind: output, shape index: {}]  }
   0x1   :  { %10 = vsyncpa [#allocation3 + $0x1], 0  ;;  %s676_s12 = smov 0   ;;  %s678_s13 = smov 0  }
   0x2   :  { %s680_s14 = smov 0   ;;  %s682_s15 = smov 0  }
   0x3 LB: > { %s505_s16 = sadd.s32 4294967295, %s646_s15   ;;  %s696_s17 = sadd.s32 1, %s646_s15   ;;  %s646_s15 = sphi %s682_s15, %s813_s15   ;;  %s642_s14 = sphi %s680_s14, %s812_s14   ;;  %s638_s13 = sphi %s678_s13, %s811_s13   ;;  %s634_s12 = sphi %s676_s12, %s810_s12  }
   0x4   : > { %s20_s18 = ssub.s32 %s646_s15, %s696_s17  ;;  %s23_s19 = sadd.s32 1, %s642_s14 }
   0x5   : > { %p21_p0 = scmp.eq.s32.totalorder %s20_s18, 0  ;;  %p30_p1 = scmp.ne.s32.totalorder %s642_s14, %s638_s13 }
   0x6   : > { %p31_p2 = scmp.eq.s32.totalorder %s646_s15, 0  ;;  %p36_p3 = scmp.ne.s32.totalorder %s638_s13, %s634_s12 }
   0x7   : > { %s706_s20 = scalar_select %p21_p0, %s642_s14, %s23_s19  }
   0x8   : > { %p32_p4 = por %p31_p2, %p30_p1  ;;  %p37_p5 = scmp.eq.s32.totalorder %s505_s16, 0 }
   0x9   : > { %p535_p6 = scmp.lt.s32.totalorder %s646_s15, 4  ;;  %s138_s22 = sand.u32 1, %s642_s14  }
   0xa   : > { %p711_p7 = por %p37_p5, %p36_p3  ;;  %s509_s23 = sshll.u32 %s138_s22, 5 }
   0xb   : > { %s527_s24 = sshll.u32 %s646_s15, 9  ;;  %s142_s28 = scalar_lea.vmem [#allocation2], %s509_s23 }
   0xc   : > { %s806_s21 = scalar_select %p711_p7, 1, 0 }
   0xd   : > { %s720_s27 = scalar_lea.hbm %s801_s0, %s527_s24  ;;  %s150_s29 = sshll.u32 %s142_s28, 4  ;;  %s722_s29 = int_to_ptr.vmem [resolvable:$true] %s150_s29 }
   0xe   : > { %p724_p8 = pnand %p535_p6, %p32_p4  ;;  %s729_s4 = scalar_lea.sflag [#allocation3], %s138_s22 }
   0xf   : > { %s584_s5 = scalar_lea.hbm %s720_s27, 512  ;;  %s589_s8 = scalar_lea.hbm %s801_s0, 2048 }
  0x10   : > { %p585_p10 = scmp.ne.s32.totalorder %s720_s27, %s584_s5  ;;  %p586_p11 = pneg %p724_p8 }
  0x11   : > { %p590_p0 = scmp.lt.s32.totalorder %s720_s27, %s801_s0  ;;  %p591_p1 = scmp.lt.s32.totalorder %s589_s8, %s584_s5 }
  0x12   : > { %p587_p12 = pnand %p586_p11, %p585_p10 }
  0x13   : > { %p592_p2 = por %p591_p1, %p590_p0 }
  0x14   : > { %p588_p13 = pneg %p587_p12 }
  0x16   : > { %p593_p3 = pnand %p592_p2, %p588_p13 }
  0x18   : > { %596 = shalt.err (!%p593_p3)
}
  0x19   : > { %s597_s11 = scalar_lea.vmem %s722_s29, 512  ;;  %s648_s12 = smov [#allocation2]  }
  0x1a   : > { %p598_p4 = scmp.ne.s32.totalorder %s722_s29, %s597_s11  ;;  %s602_s18 = sshll.u32 %s648_s12, 4  ;;  %s603_s18 = int_to_ptr.vmem [resolvable:$false] %s602_s18 }
  0x1b   : > { %s604_s19 = scalar_lea.vmem %s603_s18, 1024  ;;  %p605_p10 = scmp.lt.s32.totalorder %s722_s29, %s603_s18 }
  0x1c   : > { %p600_p5 = pnand %p598_p4, %p586_p11  ;;  %p606_p12 = scmp.lt.s32.totalorder %s604_s19, %s597_s11 }
  0x1e   : > { %p601_p6 = pneg %p600_p5  ;;  %p607_p9 = por %p606_p12, %p605_p10 }
  0x20   : > { %p608_p7 = pnand %p607_p9, %p601_p6 }
  0x22   : > { %611 = shalt.err (!%p608_p7)
}
  0x23   : > { %s649_s22 = smov 128   ;;  %s650_s23 = smov 8  }
  0x24   : > { %534 = dma.hbm_to_vmem [thread:$0]  (!%p724_p8), %s720_s27, 512, %s722_s29, %s729_s4, %s649_s22, %s649_s22, %s650_s23  }
  0x25   : > { %p174_p11 = scmp.lt.s32.totalorder %s646_s15, 5  ;;  %p808_p13 = scmp.ge.s32.totalorder %s646_s15, 1 }
  0x27   : > { %p175_p0 = pnand %p808_p13, %p174_p11 }
  0x28   : > { %s180_s24 = sand.u32 (!%p175_p0), 1, %s638_s13   ;;  %p809_p7 = scmp.ne.s32.totalorder (!%p175_p0), %s806_s21, 0 }
  0x29   : > { %178 = sbr.rel (%p175_p0) target bundleno = 335 (0x14f), region = 32  ;;  %s514_s25 = sshll.u32 (!%p175_p0), %s180_s24, 5 }
  0x2a   : > { %s181_s26 = scalar_lea.sflag (!%p175_p0), [#allocation3], %s180_s24  ;;  %s754_s28 = scalar_lea.vmem (!%p175_p0), [#allocation2], %s514_s25 }
  0x2e   : > { %629 = dma.done.wait (%p809_p7), %s181_s26, 512  }
  0x2f   : > { %631 = vsyncadd (%p809_p7), %s181_s26, 4294966784  ;;  %s515_s30 = sshll.u32 %s505_s16, 1  ;;  %v651_v0 = vmov 1   ;;  %v652_v1 = vmov 2   ;;  %v653_v5 = vmov 0   ;;  %v238_v7 = vld [vmem:[%s754_s28] sm:$0xff] }
  0x30   : > { %575 = vset.pattern.permute.xlu0 %v651_v0  ;;  %p218_p8 = scmp.lt.s32.totalorder %s515_s30, 7  ;;  %576 = vset.pattern.permute.xlu1 %v652_v1  ;;  %v239_v8 = vld [vmem:[%s754_s28 + $0x8] sm:$0xff]  ;;  %v240_v13 = vld [vmem:[%s754_s28 + $0x10] sm:$0xff]  ;;  %s654_s5 = smov 127   ;;  %v241_v14 = vld [vmem:[%s754_s28 + $0x18] sm:$0xff]  ;;  %vm366_vm0 = vcmask 1046528  }
  0x31   : > { %s655_s6 = smov 126   ;;  %vm397_vm1 = vcmask 1045504   ;;  %vm414_vm2 = vcmask 93184   ;;  %vm412_vm3 = vcmask 97280  }
  0x32   : > { %s815_s30 = smov (!%p218_p8, %s515_s30), 7 }
  0x33   : > { %s225_s4 = scalar_lea.vmem %s803_s2, %s815_s30  ;;  %s220_s16 = scalar_lea.vmem %s802_s1, %s815_s30 }
  0x34   : > { %v520_v2 = vld [vmem:[%s225_s4] ss:$0 sm:$0xff]  ;;  %v521_v3 = vld [vmem:[%s225_s4 + $0x1] ss:$0 sm:$0xff]  ;;  %s528_s7 = sshll.u32 %s815_s30, 4 }
  0x35   : > { %265 = vperm.xlu0 %575, %v520_v2   ;;  %297 = vperm.xlu1 %576, %v520_v2   ;;  %v523_v4 = vld [vmem:[%s220_s16 + $0x1] ss:$0 sm:$0xff]  ;;  %v522_v6 = vld [vmem:[%s220_s16] ss:$0 sm:$0xff]  ;;  %s232_s10 = scalar_lea.vmem %s804_s3, %s528_s7 }
  0x39   : > { %269 = vperm.xlu0 %575, %v521_v3   ;;  %301 = vperm.xlu1 %576, %v521_v3  }
  0x3d   : > { %355 = vperm.xlu0 %575, %v523_v4   ;;  %577 = vset.pattern.permute.xlu1 %v653_v5 }
  0x3e   : > { %257 = vperm.xlu1 %577, %v521_v3  }
  0x41   : > { %579 = vset.pattern.permute.xlu0 %v652_v1 }
  0x42   : > { %382 = vperm.xlu0 %579, %v522_v6   ;;  %578 = vset.pattern.permute.xlu1 %v651_v0 }
  0x43   : > { %351 = vperm.xlu1 %578, %v522_v6  }
  0x46   : > { %580 = vset.pattern.permute.xlu0 %v653_v5 }
  0x47   : > { %253 = vperm.xlu0 %580, %v520_v2   ;;  %581 = vset.pattern.permute.xlu1 %v652_v1 }
  0x48   : > { %386 = vperm.xlu1 %581, %v523_v4  }
  0x4b   : > { %339 = vperm.xlu0 %580, %v522_v6  }
  0x4c   : > { %582 = vset.pattern.permute.xlu1 %v653_v5 }
  0x4f   : > { %583 = vset.pattern.permute.xlu0 %v652_v1 }
  0xb0   : > { %v266_v9 = vpop.permute.xlu0 %265  ;;  %v298_v10 = vpop.permute.xlu1 %297 }
  0xb1   : > { %v272_v11 = vmul.f32 %v266_v9, %v238_v7  ;;  %v273_v12 = vmul.f32 %v266_v9, %v239_v8  ;;  %v304_v20 = vmul.f32 %v298_v10, %v238_v7  ;;  %v305_v21 = vmul.f32 %v298_v10, %v239_v8 }
  0xb3   : > { %280 = vrot.lane.b32.xlu0 %v272_v11, %s654_s5  ;;  %282 = vrot.lane.b32.xlu1 %v273_v12, %s654_s5 }
  0xb4   : > { %v270_v15 = vpop.permute.xlu0 %269  ;;  %v302_v16 = vpop.permute.xlu1 %301 }
  0xb5   : > { %v274_v17 = vmul.f32 %v270_v15, %v240_v13  ;;  %v307_v18 = vmul.f32 %v302_v16, %v241_v14  ;;  %v275_v19 = vmul.f32 %v270_v15, %v241_v14  ;;  %v306_v22 = vmul.f32 %v302_v16, %v240_v13 }
  0xb7   : > { %284 = vrot.lane.b32.xlu1 %v274_v17, %s654_s5  ;;  %318 = vrot.lane.b32.xlu0 %v307_v18, %s655_s6 }
  0xb8   : > { %v356_v24 = vpop.permute.xlu0 %355 }
  0xb9   : > { %v258_v23 = vpop.permute.xlu1 %257 }
  0xba   : > { %v263_v35 = vmul.f32 %v258_v23, %v241_v14  ;;  %v262_v46 = vmul.f32 %v258_v23, %v240_v13 }
  0xbb   : > { %286 = vrot.lane.b32.xlu1 %v275_v19, %s654_s5 }
  0xbd   : > { %v383_v26 = vpop.permute.xlu0 %382 }
  0xbe   : > { %v352_v25 = vpop.permute.xlu1 %351 }
  0xbf   : > { %312 = vrot.lane.b32.xlu1 %v304_v20, %s655_s6 }
  0xc2   : > { %v254_v28 = vpop.permute.xlu0 %253 }
  0xc3   : > { %314 = vrot.lane.b32.xlu1 %v305_v21, %s655_s6  ;;  %v387_v27 = vpop.permute.xlu1 %386  ;;  %v260_v32 = vmul.f32 %v254_v28, %v238_v7  ;;  %v261_v36 = vmul.f32 %v254_v28, %v239_v8 }
  0xc6   : > { %v340_v30 = vpop.permute.xlu0 %339 }
  0xc7   : > { %316 = vrot.lane.b32.xlu1 %v306_v22, %s655_s6 }
  0xcb   : > { %343 = vperm.xlu1 %582, %v523_v4  }
 0x125   : > { %v283_v29 = vpop.permute.xlu1 %282  ;;  %v281_v33 = vpop.permute.xlu0 %280 }
 0x126   : > { %v292_v37 = vadd.f32 %v281_v33, %v260_v32  ;;  %v293_v42 = vadd.f32 %v283_v29, %v261_v36 }
 0x129   : > { %v285_v31 = vpop.permute.xlu1 %284  ;;  %v319_v40 = vpop.permute.xlu0 %318 }
 0x12a   : > { %v294_v49 = vadd.f32 %v285_v31, %v262_v46 }
 0x12d   : > { %v287_v34 = vpop.permute.xlu1 %286 }
 0x12e   : > { %v295_v38 = vadd.f32 %v287_v34, %v263_v35 }
 0x130   : > { %v327_v43 = vadd.f32 %v319_v40, %v295_v38 }
 0x131   : > { %v313_v39 = vpop.permute.xlu1 %312 }
 0x132   : > { %v324_v41 = vadd.f32 %v313_v39, %v292_v37  ;;  %v392_v52 = vmul.f32 %v387_v27, %v327_v43  ;;  %v361_v55 = vmul.f32 %v356_v24, %v327_v43 }
 0x134   : > { %v358_v44 = vmul.f32 %v352_v25, %v324_v41  ;;  %v389_v48 = vmul.f32 %v383_v26, %v324_v41  ;;  %v346_v60 = vmul.f32 %v340_v30, %v324_v41  ;;  %v402_v2 = vrot.slane %v392_v52, 2 }
 0x135   : > { %v315_v45 = vpop.permute.xlu1 %314  ;;  %v371_v8 = vrot.slane %v361_v55, 1 }
 0x136   : > { %v325_v47 = vadd.f32 %v315_v45, %v293_v42  ;;  %v367_v53 = vrot.slane %v358_v44, 1  ;;  %v398_v61 = vrot.slane %v389_v48, 2 }
 0x138   : > { %v359_v50 = vmul.f32 %v352_v25, %v325_v47  ;;  %v390_v51 = vmul.f32 %v383_v26, %v325_v47  ;;  %v347_v56 = vmul.f32 %v340_v30, %v325_v47 }
 0x139   : > { %v317_v54 = vpop.permute.xlu1 %316 }
 0x13a   : > { %v368_v57 = vrot.slane %v359_v50, 1  ;;  %v399_v58 = vrot.slane %v390_v51, 2  ;;  %v326_v59 = vadd.f32 %v317_v54, %v294_v49 }
 0x13c   : > { %v378_v62 = vadd.f32 %v368_v57, %v347_v56  ;;  %v360_v63 = vmul.f32 %v356_v24, %v326_v59  ;;  %v391_v0 = vmul.f32 %v387_v27, %v326_v59  ;;  %v369_v1 = vsel %vm366_vm0, %v367_v53, %v368_v57 }
 0x13d   : > { %v377_v3 = vadd.f32 %v369_v1, %v346_v60  ;;  %v400_v4 = vsel %vm397_vm1, %v398_v61, %v399_v58 }
 0x13e   : > { %v409_v5 = vadd.f32 %v399_v58, %v378_v62  ;;  %v370_v6 = vrot.slane %v360_v63, 1  ;;  %v401_v7 = vrot.slane %v391_v0, 2 }
 0x13f   : > { %v408_v9 = vadd.f32 %v400_v4, %v377_v3 }
 0x140   : > { %415 = vst.msk [vmem:[%s232_s10 + $0x8] sm:$0xf] %vm414_vm2, %v409_v5  ;;  %v372_v10 = vsel %vm366_vm0, %v370_v6, %v371_v8  ;;  %v403_v11 = vsel %vm397_vm1, %v401_v7, %v402_v2 }
 0x141   : > { %413 = vst.msk [vmem:[%s232_s10] sm:$0xff] %vm412_vm3, %v408_v9 }
 0x146   : > { %v344_v12 = vpop.permute.xlu1 %343 }
 0x147   : > { %v348_v13 = vmul.f32 %v344_v12, %v326_v59  ;;  %v349_v14 = vmul.f32 %v344_v12, %v327_v43 }
 0x149   : > { %v379_v15 = vadd.f32 %v372_v10, %v348_v13  ;;  %v380_v16 = vadd.f32 %v371_v8, %v349_v14 }
 0x14b   : > { %v410_v17 = vadd.f32 %v403_v11, %v379_v15  ;;  %v411_v18 = vadd.f32 %v402_v2, %v380_v16 }
 0x14d   : > { %416 = vst.msk [vmem:[%s232_s10 + $0x10] sm:$0xff] %vm412_vm3, %v410_v17 }
 0x14e   : > { %417 = vst.msk [vmem:[%s232_s10 + $0x18] sm:$0xf] %vm414_vm2, %v411_v18 }
 0x14f PF: > { %p13_p9 = scmp.ge.s32.totalorder %s696_s17, 6   ;;  %s810_s12 = smov %s638_s13 }
 0x150   : > { %s811_s13 = smov %s642_s14  ;;  %s812_s14 = smov %s706_s20 }
 0x151   : > { %s813_s15 = smov %s696_s17  ;;  %15 = sbr.rel (!%p13_p9) target bundleno = 3 (0x3), region = 78 }
 0x156   :  { %442 = vsyncpa [#allocation3], 1 }
 0x157   :  { %444 = vsyncpa [#allocation3 + $0x1], 1 }

</bundles_post_ra>
